<compile_context>
chip_gen: v7x
topology: tpu7x:2x2x1
jax: 0.10.0
libtpu: 0.0.40
codegen_flags: <defaults>
</compile_context>

<pallas_src>
import functools

import jax
import jax.numpy as jnp
from jax.experimental import pallas as pl
from jax.experimental.pallas import tpu as pltpu

BN_EPS = 1e-5  # PyTorch BatchNorm1d default
LANE = 128     # TPU lane width


def _round_up(x, m):
    return (x + m - 1) // m * m


# ---------------------------------------------------------------------------
# Kernel: one row-tile of the fused classifier.
#   x @ w1' + b1' -> ReLU -> @ w2' + b2'   (BN0/BN1 folded into w1'/b1')
# ---------------------------------------------------------------------------
def _classifier_kernel(
    x_ref,    # (TM, H)   input rows, native f32
    w1_ref,   # (H, Fp)   fc1 weight with both BatchNorms folded in (f32)
    b1_ref,   # (1, Fp)   folded bias (f32)
    w2_ref,   # (Fp, L)   fc_out weight, zero-padded rows for Fp > F (f32)
    b2_ref,   # (1, L)    fc_out bias (f32)
    out_ref,  # (TM, L)   f32 output tile
    *, matmul_dtype,
):
    # In-kernel cast of matmul operands (no-op for f32); HBM copies stay f32.
    x = x_ref[...].astype(matmul_dtype)
    w1 = w1_ref[...].astype(matmul_dtype)

    # fc1 (+ folded BatchNorms): MXU matmul with f32 accumulation, then ReLU.
    h = jnp.dot(x, w1, preferred_element_type=jnp.float32)
    h = jnp.maximum(h + b1_ref[...], 0.0)

    # Dropout: identity in eval/inference mode.
    # TODO(synk): train-mode stochastic dropout not implemented (inference path).

    # fc_out: second MXU matmul (tiny N), f32 accumulation.
    out = jnp.dot(h.astype(matmul_dtype), w2_ref[...].astype(matmul_dtype),
                  preferred_element_type=jnp.float32)
    out_ref[...] = (out + b2_ref[...]).astype(out_ref.dtype)


# ---------------------------------------------------------------------------
# Parameter folding: BN(eval) -> affine, absorbed into fc1; F padded to 128x.
# Folded weights are kept in f32 (any bf16 rounding happens only in-kernel).
# ---------------------------------------------------------------------------
def _fold_params(params, fc_hidden_pad):
    (bn_g, bn_b, bn_m, bn_v,
     w1, b1,
     bn1_g, bn1_b, bn1_m, bn1_v,
     w2, b2) = params

    # BN0: y = x*scale0 + shift0
    scale0 = bn_g / jnp.sqrt(bn_v + BN_EPS)        # (1, H)
    shift0 = bn_b - bn_m * scale0                  # (1, H)
    # BN1: y = h*scale1 + shift1
    scale1 = bn1_g / jnp.sqrt(bn1_v + BN_EPS)      # (1, F)
    shift1 = bn1_b - bn1_m * scale1                # (1, F)

    # Fold: BN1(BN0(x) @ w1 + b1) == x @ w1_eff + b1_eff
    w1_eff = (scale0.reshape(-1, 1) * w1) * scale1            # (H, F)
    b1_eff = (shift0 @ w1 + b1) * scale1 + shift1             # (1, F)

    fc_hidden = w1.shape[1]
    pad = fc_hidden_pad - fc_hidden

    # Pad F -> Fp. Padded b1 columns are 0, so ReLU gives 0 there, and the
    # matching w2 rows are zero, so the padding contributes nothing.
    w1_eff = jnp.pad(w1_eff, ((0, 0), (0, pad)))
    b1_eff = jnp.pad(b1_eff, ((0, 0), (0, pad)))
    w2_eff = jnp.pad(w2, ((0, pad), (0, 0)))

    return (w1_eff.astype(jnp.float32), b1_eff.astype(jnp.float32),
            w2_eff.astype(jnp.float32), b2.astype(jnp.float32))


# ---------------------------------------------------------------------------
# Wrapper.
# ---------------------------------------------------------------------------
def custom_classifier_forward(x, params, *, row_tile=1024,
                              matmul_dtype=jnp.float32):
    """x: (batch, seq, hidden). Returns (batch, seq, num_labels) float32."""
    batch, seq_len, hidden = x.shape
    n_rows = batch * seq_len

    fc_hidden = params[4].shape[1]
    num_labels = params[10].shape[1]
    fc_hidden_pad = _round_up(fc_hidden, LANE)

    # Tile sizing:
    #   * never larger than the (8-rounded) row count,
    #   * if there is enough work (>= 512 rows), cap so grid >= 2 steps so
    #     v7x's two TensorCores both get a share (harmless on v5e/v6e).
    row_tile = max(8, min(row_tile, _round_up(n_rows, 8)))
    if n_rows >= 512:
        row_tile = min(row_tile, _round_up((n_rows + 1) // 2, 8))

    w1_eff, b1_eff, w2_eff, b2_eff = _fold_params(params, fc_hidden_pad)

    # No wrapper-side cast or row padding: Pallas handles the ragged last tile
    # (OOB reads are padded, OOB writes masked), and dtype casts happen in-kernel.
    x2d = x.reshape(n_rows, hidden)
    grid = (pl.cdiv(n_rows, row_tile),)

    kernel = functools.partial(_classifier_kernel, matmul_dtype=matmul_dtype)

    out2d = pl.pallas_call(
        kernel,
        out_shape=jax.ShapeDtypeStruct((n_rows, num_labels), jnp.float32),
        grid_spec=pltpu.PrefetchScalarGridSpec(
            num_scalar_prefetch=0,
            grid=grid,
            in_specs=[
                pl.BlockSpec((row_tile, hidden), lambda i: (i, 0)),        # x rows
                pl.BlockSpec((hidden, fc_hidden_pad), lambda i: (0, 0)),   # w1'
                pl.BlockSpec((1, fc_hidden_pad), lambda i: (0, 0)),        # b1'
                pl.BlockSpec((fc_hidden_pad, num_labels), lambda i: (0, 0)),  # w2'
                pl.BlockSpec((1, num_labels), lambda i: (0, 0)),           # b2'
            ],
            out_specs=pl.BlockSpec((row_tile, num_labels), lambda i: (i, 0)),
        ),
        compiler_params=pltpu.CompilerParams(
            dimension_semantics=("parallel",),
        ),
    )(x2d, w1_eff, b1_eff, w2_eff, b2_eff)

    return out2d.reshape(batch, seq_len, num_labels)


# ---------------------------------------------------------------------------
# Synthetic parameters (shapes match CustomClassifier.__init__).
# ---------------------------------------------------------------------------
def init_params(key, hidden_size, num_labels, fc_hidden_size=500):
    ks = jax.random.split(key, 8)

    def uniform(k, shape, bound):
        return jax.random.uniform(
            k, shape, dtype=jnp.float32, minval=-bound, maxval=bound)

    # BatchNorm1d(hidden_size) — affine params + running stats (eval mode).
    bn_g = 1.0 + 0.1 * jax.random.normal(ks[0], (1, hidden_size), jnp.float32)
    bn_b = 0.1 * jax.random.normal(ks[1], (1, hidden_size), jnp.float32)
    bn_m = 0.05 * jax.random.normal(ks[2], (1, hidden_size), jnp.float32)
    bn_v = jnp.abs(1.0 + 0.1 * jax.random.normal(ks[3], (1, hidden_size),
                                                 jnp.float32))

    # fc1: Linear(hidden_size, fc_hidden_size); stored as (in, out).
    bound1 = 1.0 / (hidden_size ** 0.5)
    w1 = uniform(ks[4], (hidden_size, fc_hidden_size), bound1)
    b1 = uniform(ks[5], (1, fc_hidden_size), bound1)

    # fc1_bn: BatchNorm1d(fc_hidden_size).
    bn1_g = 1.0 + 0.05 * jax.random.normal(ks[6], (1, fc_hidden_size),
                                           jnp.float32)
    bn1_b = jnp.zeros((1, fc_hidden_size), jnp.float32)
    bn1_m = jnp.zeros((1, fc_hidden_size), jnp.float32)
    bn1_v = jnp.ones((1, fc_hidden_size), jnp.float32)

    # fc_out: Linear(fc_hidden_size, num_labels); stored as (in, out).
    bound2 = 1.0 / (fc_hidden_size ** 0.5)
    w2 = uniform(ks[7], (fc_hidden_size, num_labels), bound2)
    b2 = jnp.zeros((1, num_labels), jnp.float32)

    return (bn_g, bn_b, bn_m, bn_v, w1, b1, bn1_g, bn1_b, bn1_m, bn1_v, w2, b2)


def _reference_forward(x, params):
    """Pure-JAX reference of the PyTorch forward (eval mode)."""
    (bn_g, bn_b, bn_m, bn_v, w1, b1, bn1_g, bn1_b, bn1_m, bn1_v, w2, b2) = params
    b, s, h = x.shape
    z = x.reshape(-1, h)
    z = (z - bn_m) / jnp.sqrt(bn_v + BN_EPS) * bn_g + bn_b
    z = z @ w1 + b1
    z = (z - bn1_m) / jnp.sqrt(bn1_v + BN_EPS) * bn1_g + bn1_b
    z = jnp.maximum(z, 0.0)
    z = z @ w2 + b2
    return z.reshape(b, s, -1)


if __name__ == "__main__":
    hidden_size = 32
    num_labels = 4
    fc_hidden_size = 500   # module default
    batch, seq_len = 2, 8

    key = jax.random.PRNGKey(0)
    k_x, k_p, k_x2 = jax.random.split(key, 3)
    x = jax.random.normal(k_x, (batch, seq_len, hidden_size), jnp.float32)
    params = init_params(k_p, hidden_size, num_labels, fc_hidden_size)

    # --- f32 path, small shape (single grid step, clamped row tile) ---------
    out = custom_classifier_forward(x, params)
    out = jax.block_until_ready(out)
    ref = _reference_forward(x, params)
    assert out.shape == (batch, seq_len, num_labels)
    assert jnp.allclose(out, ref, atol=1e-4, rtol=1e-4), "f32 mismatch vs reference"

    # --- f32 path, larger shape: ragged tail + 2-step grid (v7x TC split) ---
    batch2, seq2 = 3, 267   # 801 rows -> row_tile 408, grid of 2, masked tail
    x_big = jax.random.normal(k_x2, (batch2, seq2, hidden_size), jnp.float32)
    out_big = custom_classifier_forward(x_big, params)
    out_big = jax.block_until_ready(out_big)
    ref_big = _reference_forward(x_big, params)
    assert out_big.shape == (batch2, seq2, num_labels)
    assert jnp.allclose(out_big, ref_big, atol=1e-4, rtol=1e-4), \
        "f32 (ragged rows) mismatch vs reference"

    # --- bf16 matmul operands (MXU-native path), f32 accumulation -----------
    out_bf16 = custom_classifier_forward(x, params, matmul_dtype=jnp.bfloat16)
    out_bf16 = jax.block_until_ready(out_bf16)
    assert out_bf16.shape == (batch, seq_len, num_labels)
    assert jnp.allclose(out_bf16, ref, atol=1e-1, rtol=5e-2), \
        "bf16 mismatch vs reference"

    print("KERNEL_OK")
</pallas_src>

<mosaic_0001>
module attributes {stable_mosaic.version = 11 : i64} {
  func.func @_classifier_kernel(%arg0: i32, %arg1: memref<16x32xf32, #tpu.memory_space<vmem>>, %arg2: memref<32x512xf32, #tpu.memory_space<vmem>>, %arg3: memref<1x512xf32, #tpu.memory_space<vmem>>, %arg4: memref<512x4xf32, #tpu.memory_space<vmem>>, %arg5: memref<1x4xf32, #tpu.memory_space<vmem>>, %arg6: memref<16x4xf32, #tpu.memory_space<vmem>>) attributes {dimension_semantics = [#tpu.dimension_semantics<parallel>], iteration_bounds = array<i64: 1>, scalar_prefetch = 0 : i64, scratch_operands = 0 : i64, tpu.core_type = #tpu.core_type<tc>, window_params = [{transform_indices = @transform_0, window_bounds = array<i64: 16, 32>}, {pipeline_mode = #tpu.pipeline_mode<synchronous>, transform_indices = @transform_1, window_bounds = array<i64: 32, 512>}, {pipeline_mode = #tpu.pipeline_mode<synchronous>, transform_indices = @transform_2, window_bounds = array<i64: 1, 512>}, {pipeline_mode = #tpu.pipeline_mode<synchronous>, transform_indices = @transform_3, window_bounds = array<i64: 512, 4>}, {pipeline_mode = #tpu.pipeline_mode<synchronous>, transform_indices = @transform_4, window_bounds = array<i64: 1, 4>}, {transform_indices = @transform_5, window_bounds = array<i64: 16, 4>}]} {
    %c0 = arith.constant 0 : index
    %c0_0 = arith.constant 0 : index
    %0 = vector.load %arg1[%c0, %c0_0] : memref<16x32xf32, #tpu.memory_space<vmem>>, vector<16x32xf32>
    %c0_1 = arith.constant 0 : index
    %c0_2 = arith.constant 0 : index
    %1 = vector.load %arg2[%c0_1, %c0_2] : memref<32x512xf32, #tpu.memory_space<vmem>>, vector<32x512xf32>
    %cst = arith.constant dense<0.000000e+00> : vector<16x512xf32>
    %2 = tpu.matmul %0, %1, %cst {dimension_numbers = #tpu.dot_dimension_numbers<[1], [0], [0], [1], [0, 0, 1, 1], [], []>} : vector<16x32xf32>, vector<32x512xf32>, vector<16x512xf32> -> vector<16x512xf32>
    %c0_3 = arith.constant 0 : index
    %c0_4 = arith.constant 0 : index
    %3 = vector.load %arg3[%c0_3, %c0_4] : memref<1x512xf32, #tpu.memory_space<vmem>>, vector<1x512xf32>
    %4 = vector.broadcast %3 : vector<1x512xf32> to vector<16x512xf32>
    %5 = arith.addf %2, %4 : vector<16x512xf32>
    %cst_5 = arith.constant 0.000000e+00 : f32
    %6 = vector.broadcast %cst_5 : f32 to vector<16x512xf32>
    %7 = arith.maximumf %5, %6 : vector<16x512xf32>
    %c0_6 = arith.constant 0 : index
    %c0_7 = arith.constant 0 : index
    %8 = vector.load %arg4[%c0_6, %c0_7] : memref<512x4xf32, #tpu.memory_space<vmem>>, vector<512x4xf32>
    %cst_8 = arith.constant dense<0.000000e+00> : vector<16x4xf32>
    %9 = tpu.matmul %7, %8, %cst_8 {dimension_numbers = #tpu.dot_dimension_numbers<[1], [0], [0], [1], [0, 0, 1, 1], [], []>} : vector<16x512xf32>, vector<512x4xf32>, vector<16x4xf32> -> vector<16x4xf32>
    %c0_9 = arith.constant 0 : index
    %c0_10 = arith.constant 0 : index
    %10 = vector.load %arg5[%c0_9, %c0_10] : memref<1x4xf32, #tpu.memory_space<vmem>>, vector<1x4xf32>
    %11 = vector.broadcast %10 : vector<1x4xf32> to vector<16x4xf32>
    %12 = arith.addf %9, %11 : vector<16x4xf32>
    %c0_11 = arith.constant 0 : index
    %c0_12 = arith.constant 0 : index
    %13 = vector.load %arg6[%c0_11, %c0_12] : memref<16x4xf32, #tpu.memory_space<vmem>>, vector<16x4xf32>
    tpu.vector_store %arg6[%c0_11, %c0_12], %12 {strides = array<i32>} : memref<16x4xf32, #tpu.memory_space<vmem>>, vector<16x4xf32>,
    return
  }
  func.func @transform_0(%arg0: i32) -> (i32, i32) {
    %c0_i32 = arith.constant 0 : i32
    %c0_i32_0 = arith.constant 0 : i32
    return %arg0, %c0_i32 : i32, i32
  }
  func.func @transform_1(%arg0: i32) -> (i32, i32) {
    %c0_i32 = arith.constant 0 : i32
    %c0_i32_0 = arith.constant 0 : i32
    %c0_i32_1 = arith.constant 0 : i32
    return %c0_i32, %c0_i32_0 : i32, i32
  }
  func.func @transform_2(%arg0: i32) -> (i32, i32) {
    %c0_i32 = arith.constant 0 : i32
    %c0_i32_0 = arith.constant 0 : i32
    %c0_i32_1 = arith.constant 0 : i32
    return %c0_i32, %c0_i32_0 : i32, i32
  }
  func.func @transform_3(%arg0: i32) -> (i32, i32) {
    %c0_i32 = arith.constant 0 : i32
    %c0_i32_0 = arith.constant 0 : i32
    %c0_i32_1 = arith.constant 0 : i32
    return %c0_i32, %c0_i32_0 : i32, i32
  }
  func.func @transform_4(%arg0: i32) -> (i32, i32) {
    %c0_i32 = arith.constant 0 : i32
    %c0_i32_0 = arith.constant 0 : i32
    %c0_i32_1 = arith.constant 0 : i32
    return %c0_i32, %c0_i32_0 : i32, i32
  }
  func.func @transform_5(%arg0: i32) -> (i32, i32) {
    %c0_i32 = arith.constant 0 : i32
    %c0_i32_0 = arith.constant 0 : i32
    return %arg0, %c0_i32 : i32, i32
  }
}

</mosaic_0001>

<bundles_post_ra>
// kernel: tpu_custom_call.1
= control target key start
LH: loop header
LB: loop body
LE: loop exit
PB: predicated region body
PF: predicated region fallthrough
CT: control target
= control target key end

     0   :  { %v619_v3 = vmov 0.0   ;;  %vm60_vm0 = vcmask 261120   ;;  %vm450_vm1 = vcmask 31744   ;;  %s916_s1 = inlined_call_operand.vmem [shape: f32[32,512], index: 1, kind: input, shape index: {}]   ;;  %s917_s0 = inlined_call_operand.vmem [shape: f32[16,32], index: 0, kind: input, shape index: {}]   ;;  %s918_s3 = inlined_call_operand.vmem [shape: f32[512,4], index: 3, kind: input, shape index: {}]   ;;  %s919_s2 = inlined_call_operand.vmem [shape: f32[1,512], index: 2, kind: input, shape index: {}]   ;;  %s920_s4 = inlined_call_operand.vmem [shape: f32[1,4], index: 4, kind: input, shape index: {}]   ;;  %s921_s5 = inlined_call_operand.vmem [shape: f32[16,4], index: 5, kind: output, shape index: {}]  }
   0x1   :  { %v23_v0 = vld [vmem:[%s916_s1 + $0x8] sm:$0xff]  ;;  %v25_v2 = vld [vmem:[%s916_s1 + $0x18] sm:$0xff]  ;;  %131 = vmatprep.mubr.f32.mxu0 %v619_v3  ;;  %208 = vmatprep.mubr.f32.mxu1 %v619_v3  ;;  %v22_v6 = vld [vmem:[%s916_s1] sm:$0xff] }
   0x2   :  { %v27_v1 = vld [vmem:[%s916_s1 + $0x28] sm:$0xff]  ;;  %v29_v5 = vld [vmem:[%s916_s1 + $0x38] sm:$0xff]  ;;  %v26_v7 = vld [vmem:[%s916_s1 + $0x20] sm:$0xff] }
   0x3   :  { %v538_v4 = vpack.c.bf16 %v27_v1, %v23_v0  ;;  %v546_v8 = vpack.c.bf16 %v29_v5, %v25_v2  ;;  %v540_v9 = vpack.c.bf16 %v26_v7, %v22_v6  ;;  %v24_v10 = vld [vmem:[%s916_s1 + $0x10] sm:$0xff]  ;;  %v31_v12 = vld [vmem:[%s916_s1 + $0x48] sm:$0xff]  ;;  %v33_v15 = vld [vmem:[%s916_s1 + $0x58] sm:$0xff] }
   0x4   :  { %v28_v11 = vld [vmem:[%s916_s1 + $0x30] sm:$0xff]  ;;  %v35_v14 = vld [vmem:[%s916_s1 + $0x68] sm:$0xff]  ;;  %v37_v16 = vld [vmem:[%s916_s1 + $0x78] sm:$0xff] }
   0x5   :  { %539 = vmatprep.subr.bf16.mxu0 %v538_v4  ;;  %v548_v13 = vpack.c.bf16 %v28_v11, %v24_v10  ;;  %547 = vmatprep.subr.bf16.mxu1 %v546_v8  ;;  %v542_v17 = vpack.c.bf16 %v35_v14, %v31_v12  ;;  %v550_v18 = vpack.c.bf16 %v37_v16, %v33_v15  ;;  %v30_v19 = vld [vmem:[%s916_s1 + $0x40] sm:$0xff]  ;;  %v32_v21 = vld [vmem:[%s916_s1 + $0x50] sm:$0xff]  ;;  %v246_v27 = vld [vmem:[%s918_s3 + $0x88] sm:$0xff] }
   0x6   :  { %541 = vmatpush1.bf16.msra.mxu0 %v540_v9  ;;  %v34_v20 = vld [vmem:[%s916_s1 + $0x60] sm:$0xff]  ;;  %v36_v23 = vld [vmem:[%s916_s1 + $0x70] sm:$0xff]  ;;  %v278_v30 = vld [vmem:[%s918_s3 + $0x188] sm:$0xff] }
   0x7   :  { %549 = vmatpush1.bf16.msra.mxu1 %v548_v13  ;;  %v544_v22 = vpack.c.bf16 %v34_v20, %v30_v19  ;;  %543 = vmatprep.subr.bf16.mxu0 %v542_v17  ;;  %v552_v24 = vpack.c.bf16 %v36_v23, %v32_v21  ;;  %v20_v25 = vld [vmem:[%s917_s0] sm:$0xff]  ;;  %v230_v32 = vld [vmem:[%s918_s3 + $0x8] sm:$0xff]  ;;  %v247_v36 = vld [vmem:[%s918_s3 + $0x90] sm:$0xff] }
   0x8   :  { %551 = vmatprep.subr.bf16.mxu1 %v550_v18  ;;  %v245_v26 = vld [vmem:[%s918_s3 + $0x80] sm:$0xff]  ;;  %v262_v35 = vld [vmem:[%s918_s3 + $0x108] sm:$0xff]  ;;  %v248_v38 = vld [vmem:[%s918_s3 + $0x98] sm:$0xff] }
   0x9   :  { %v277_v28 = vld [vmem:[%s918_s3 + $0x180] sm:$0xff]  ;;  %v554_v29 = vpack.c.bf16 %v246_v27, %v245_v26  ;;  %v279_v39 = vld [vmem:[%s918_s3 + $0x190] sm:$0xff]  ;;  %v280_v40 = vld [vmem:[%s918_s3 + $0x198] sm:$0xff]  ;;  %v558_v42 = vpack.c.bf16 %v248_v38, %v247_v36 }
   0xa   :  { %v229_v31 = vld [vmem:[%s918_s3] sm:$0xff]  ;;  %545 = vmatpush1.bf16.msra.mxu0 %v544_v22  ;;  %v586_v33 = vpack.c.bf16 %v278_v30, %v277_v28  ;;  %v231_v43 = vld [vmem:[%s918_s3 + $0x10] sm:$0xff]  ;;  %v232_v44 = vld [vmem:[%s918_s3 + $0x18] sm:$0xff]  ;;  %v590_v46 = vpack.c.bf16 %v280_v40, %v279_v39 }
   0xb   :  { %v261_v34 = vld [vmem:[%s918_s3 + $0x100] sm:$0xff]  ;;  %553 = vmatpush1.bf16.msra.mxu1 %v552_v24  ;;  %555 = vmatprep.subr.bf16.mxu0 %v554_v29  ;;  %v556_v37 = vpack.c.bf16 %v230_v32, %v229_v31  ;;  %v263_v45 = vld [vmem:[%s918_s3 + $0x110] sm:$0xff]  ;;  %v264_v47 = vld [vmem:[%s918_s3 + $0x118] sm:$0xff]  ;;  %v560_v53 = vpack.c.bf16 %v232_v44, %v231_v43 }
   0xc   :  { %587 = vmatprep.subr.bf16.mxu1 %v586_v33  ;;  %v588_v41 = vpack.c.bf16 %v262_v35, %v261_v34  ;;  %v249_v48 = vld [vmem:[%s918_s3 + $0xa0] sm:$0xff]  ;;  %v250_v49 = vld [vmem:[%s918_s3 + $0xa8] sm:$0xff]  ;;  %v592_v54 = vpack.c.bf16 %v264_v47, %v263_v45  ;;  %v251_v61 = vld [vmem:[%s918_s3 + $0xb0] sm:$0xff] }
   0xd   :  { %457 = vmatmul.mubr.msk.f32.vlgmr.msra.gmra.mrb[0].mxu0 %vm60_vm0, %v20_v25  ;;  %v21_v50 = vld [vmem:[%s917_s0 + $0x8] sm:$0xff]  ;;  %v281_v51 = vld [vmem:[%s918_s3 + $0x1a0] sm:$0xff]  ;;  %v562_v55 = vpack.c.bf16 %v250_v49, %v249_v48  ;;  %v252_v62 = vld [vmem:[%s918_s3 + $0xb8] sm:$0xff] }
   0xe   :  { %459 = vmatmul.mubr.msk.f32.vlgmr.msra.gmra.mrb[0].mxu1 %vm60_vm0, %v20_v25  ;;  %137 = vmatprep.mubr.f32.mxu0 %v619_v3  ;;  %v282_v52 = vld [vmem:[%s918_s3 + $0x1a8] sm:$0xff]  ;;  %v233_v56 = vld [vmem:[%s918_s3 + $0x20] sm:$0xff]  ;;  %v283_v63 = vld [vmem:[%s918_s3 + $0x1b0] sm:$0xff] }
   0xf   :  { %214 = vmatprep.mubr.f32.mxu1 %v619_v3  ;;  %557 = vmatpush3.bf16.msra.mxu0 %v556_v37  ;;  %v234_v57 = vld [vmem:[%s918_s3 + $0x28] sm:$0xff]  ;;  %v265_v58 = vld [vmem:[%s918_s3 + $0x120] sm:$0xff]  ;;  %v594_v59 = vpack.c.bf16 %v282_v52, %v281_v51  ;;  %v284_v0 = vld [vmem:[%s918_s3 + $0x1b8] sm:$0xff]  ;;  %v566_v3 = vpack.c.bf16 %v252_v62, %v251_v61 }
  0x10   :  { %589 = vmatpush3.bf16.msra.mxu1 %v588_v41  ;;  %559 = vmatprep.subr.bf16.mxu0 %v558_v42  ;;  %v266_v60 = vld [vmem:[%s918_s3 + $0x128] sm:$0xff]  ;;  %v564_v1 = vpack.c.bf16 %v234_v57, %v233_v56  ;;  %v235_v4 = vld [vmem:[%s918_s3 + $0x30] sm:$0xff]  ;;  %v236_v5 = vld [vmem:[%s918_s3 + $0x38] sm:$0xff]  ;;  %v598_v7 = vpack.c.bf16 %v284_v0, %v283_v63 }
  0x11   :  { %458 = vmatmul.mubr.msk.f32.gmra.mrb[2].mxu0 %vm60_vm0, %v21_v50  ;;  %591 = vmatprep.subr.bf16.mxu1 %v590_v46  ;;  %v596_v2 = vpack.c.bf16 %v266_v60, %v265_v58  ;;  %v267_v6 = vld [vmem:[%s918_s3 + $0x130] sm:$0xff]  ;;  %v268_v8 = vld [vmem:[%s918_s3 + $0x138] sm:$0xff]  ;;  %v253_v9 = vld [vmem:[%s918_s3 + $0xc0] sm:$0xff]  ;;  %v568_v13 = vpack.c.bf16 %v236_v5, %v235_v4 }
  0x12   :  { %460 = vmatmul.mubr.msk.f32.gmra.mrb[2].mxu1 %vm60_vm0, %v21_v50  ;;  %v254_v10 = vld [vmem:[%s918_s3 + $0xc8] sm:$0xff]  ;;  %v285_v11 = vld [vmem:[%s918_s3 + $0x1c0] sm:$0xff]  ;;  %v600_v14 = vpack.c.bf16 %v268_v8, %v267_v6  ;;  %v255_v21 = vld [vmem:[%s918_s3 + $0xd0] sm:$0xff] }
  0x13   :  { %561 = vmatpush3.bf16.msra.mxu0 %v560_v53  ;;  %v286_v12 = vld [vmem:[%s918_s3 + $0x1c8] sm:$0xff]  ;;  %v570_v15 = vpack.c.bf16 %v254_v10, %v253_v9  ;;  %v237_v16 = vld [vmem:[%s918_s3 + $0x40] sm:$0xff]  ;;  %v256_v22 = vld [vmem:[%s918_s3 + $0xd8] sm:$0xff] }
  0x14   :  { %593 = vmatpush3.bf16.msra.mxu1 %v592_v54  ;;  %563 = vmatprep.subr.bf16.mxu0 %v562_v55  ;;  %v238_v17 = vld [vmem:[%s918_s3 + $0x48] sm:$0xff]  ;;  %v269_v18 = vld [vmem:[%s918_s3 + $0x140] sm:$0xff]  ;;  %v602_v19 = vpack.c.bf16 %v286_v12, %v285_v11  ;;  %v287_v23 = vld [vmem:[%s918_s3 + $0x1d0] sm:$0xff]  ;;  %v574_v27 = vpack.c.bf16 %v256_v22, %v255_v21 }
  0x15   :  { %595 = vmatprep.subr.bf16.mxu1 %v594_v59  ;;  %v270_v20 = vld [vmem:[%s918_s3 + $0x148] sm:$0xff]  ;;  %v288_v24 = vld [vmem:[%s918_s3 + $0x1d8] sm:$0xff]  ;;  %v572_v25 = vpack.c.bf16 %v238_v17, %v237_v16  ;;  %v239_v28 = vld [vmem:[%s918_s3 + $0x50] sm:$0xff]  ;;  %v40_v59 = vlaneseq }
  0x16   :  { %v604_v26 = vpack.c.bf16 %v270_v20, %v269_v18  ;;  %v240_v29 = vld [vmem:[%s918_s3 + $0x58] sm:$0xff]  ;;  %v271_v30 = vld [vmem:[%s918_s3 + $0x150] sm:$0xff]  ;;  %v606_v31 = vpack.c.bf16 %v288_v24, %v287_v23  ;;  %v257_v33 = vld [vmem:[%s918_s3 + $0xe0] sm:$0xff] }
  0x17   :  { %565 = vmatpush3.bf16.msra.mxu0 %v564_v1  ;;  %v272_v32 = vld [vmem:[%s918_s3 + $0x158] sm:$0xff]  ;;  %v258_v34 = vld [vmem:[%s918_s3 + $0xe8] sm:$0xff]  ;;  %v289_v35 = vld [vmem:[%s918_s3 + $0x1e0] sm:$0xff]  ;;  %v576_v37 = vpack.c.bf16 %v240_v29, %v239_v28  ;;  %v41_v60 = vshrl.u32 %v40_v59, 7 }
  0x18   :  { %597 = vmatpush3.bf16.msra.mxu1 %v596_v2  ;;  %567 = vmatprep.subr.bf16.mxu0 %v566_v3  ;;  %v290_v36 = vld [vmem:[%s918_s3 + $0x1e8] sm:$0xff]  ;;  %v608_v38 = vpack.c.bf16 %v272_v32, %v271_v30  ;;  %v578_v39 = vpack.c.bf16 %v258_v34, %v257_v33  ;;  %v241_v41 = vld [vmem:[%s918_s3 + $0x60] sm:$0xff]  ;;  %v259_v47 = vld [vmem:[%s918_s3 + $0xf0] sm:$0xff] }
  0x19   :  { %599 = vmatprep.subr.bf16.mxu1 %v598_v7  ;;  %v610_v40 = vpack.c.bf16 %v290_v36, %v289_v35  ;;  %v242_v42 = vld [vmem:[%s918_s3 + $0x68] sm:$0xff]  ;;  %v273_v43 = vld [vmem:[%s918_s3 + $0x160] sm:$0xff]  ;;  %v260_v48 = vld [vmem:[%s918_s3 + $0xf8] sm:$0xff]  ;;  %v42_v61 = vsub.s32 0, %v41_v60  ;;  %v50_v63 = vsub.s32 2, %v41_v60  ;;  %v46_v0 = vsub.s32 1, %v41_v60 }
  0x1a   :  { %v580_v44 = vpack.c.bf16 %v242_v42, %v241_v41  ;;  %v274_v45 = vld [vmem:[%s918_s3 + $0x168] sm:$0xff]  ;;  %v291_v49 = vld [vmem:[%s918_s3 + $0x1f0] sm:$0xff]  ;;  %v582_v50 = vpack.c.bf16 %v260_v48, %v259_v47  ;;  %v292_v51 = vld [vmem:[%s918_s3 + $0x1f8] sm:$0xff]  ;;  %v54_v1 = vsub.s32 3, %v41_v60 }
  0x1b   :  { %569 = vmatpush3.bf16.msra.mxu0 %v568_v13  ;;  %v612_v46 = vpack.c.bf16 %v274_v45, %v273_v43  ;;  %v243_v52 = vld [vmem:[%s918_s3 + $0x70] sm:$0xff]  ;;  %v244_v53 = vld [vmem:[%s918_s3 + $0x78] sm:$0xff]  ;;  %v614_v54 = vpack.c.bf16 %v292_v51, %v291_v49  ;;  %v38_v62 = vld [vmem:[%s919_s2] sm:$0xf] }
  0x1c   :  { %601 = vmatpush3.bf16.msra.mxu1 %v600_v14  ;;  %571 = vmatprep.subr.bf16.mxu0 %v570_v15  ;;  %v584_v55 = vpack.c.bf16 %v244_v53, %v243_v52  ;;  %v275_v56 = vld [vmem:[%s918_s3 + $0x170] sm:$0xff]  ;;  %v276_v57 = vld [vmem:[%s918_s3 + $0x178] sm:$0xff]  ;;  %v43_v2 = vrot.slane %v38_v62, %v42_v61  ;;  %v51_v3 = vrot.slane %v38_v62, %v50_v63  ;;  %v461_v32 = vld [vmem:[%s920_s4] ss:$0 sm:$0xff] }
  0x1d   :  { %603 = vmatprep.subr.bf16.mxu1 %v602_v19  ;;  %v616_v58 = vpack.c.bf16 %v276_v57, %v275_v56  ;;  %v47_v4 = vrot.slane %v38_v62, %v46_v0  ;;  %v55_v5 = vrot.slane %v38_v62, %v54_v1 }
  0x1f   :  { %573 = vmatpush3.bf16.msra.mxu0 %v572_v25 }
  0x20   :  { %605 = vmatpush3.bf16.msra.mxu1 %v604_v26  ;;  %575 = vmatprep.subr.bf16.mxu0 %v574_v27 }
  0x21   :  { %607 = vmatprep.subr.bf16.mxu1 %v606_v31 }
  0x23   :  { %577 = vmatpush3.bf16.msra.mxu0 %v576_v37 }
  0x24   :  { %609 = vmatpush3.bf16.msra.mxu1 %v608_v38  ;;  %579 = vmatprep.subr.bf16.mxu0 %v578_v39 }
  0x25   :  { %611 = vmatprep.subr.bf16.mxu1 %v610_v40 }
  0x27   :  { %581 = vmatpush3.bf16.msra.mxu0 %v580_v44 }
  0x28   :  { %613 = vmatpush3.bf16.msra.mxu1 %v612_v46  ;;  %583 = vmatprep.subr.bf16.mxu0 %v582_v50 }
  0x29   :  { %615 = vmatprep.subr.bf16.mxu1 %v614_v54 }
  0x2b   :  { %585 = vmatpush3.bf16.msra.mxu0 %v584_v55 }
  0x2c   :  { %617 = vmatpush3.bf16.msra.mxu1 %v616_v58 }
  0xe0   :  { %v133_v6 = vpop.f32.mrb[0].mxu0 }
  0xe1   :  { %v134_v7 = vadd.f32 %v133_v6, %v43_v2  ;;  %v210_v8 = vpop.f32.mrb[0].mxu1  ;;  %v135_v9 = vpop.f32.mrb[1].mxu0 }
  0xe2   :  { %v211_v10 = vadd.f32 %v210_v8, %v51_v3  ;;  %v136_v11 = vadd.f32 %v135_v9, %v47_v4  ;;  %v212_v12 = vpop.f32.mrb[1].mxu1 }
  0xe3   :  { %v213_v13 = vadd.f32 %v212_v12, %v55_v5  ;;  %v221_v17 = vmax.f32 %v134_v7, 0.0 }
  0xe4   :  { %v223_v14 = vmax.f32 %v211_v10, 0.0  ;;  %v222_v15 = vmax.f32 %v136_v11, 0.0  ;;  %v139_v16 = vpop.f32.mrb[2].mxu0 }
  0xe5   :  { %v224_v18 = vmax.f32 %v213_v13, 0.0  ;;  %v140_v19 = vadd.f32 %v139_v16, %v43_v2  ;;  %v216_v20 = vpop.f32.mrb[2].mxu1  ;;  %v141_v21 = vpop.f32.mrb[3].mxu0 }
  0xe6   :  { %v217_v22 = vadd.f32 %v216_v20, %v51_v3  ;;  %v142_v23 = vadd.f32 %v141_v21, %v47_v4  ;;  %v218_v24 = vpop.f32.mrb[3].mxu1  ;;  %364 = vmatprep.mubr.f32.mxu0 %v222_v15 }
  0xe7   :  { %v219_v25 = vadd.f32 %v218_v24, %v55_v5  ;;  %439 = vmatprep.mubr.f32.mxu1 %v224_v18  ;;  %365 = vmatmul.mubr.f32.vlgmr.msra.gmra.mrb[4].mxu0 %v221_v17  ;;  %v225_v28 = vmax.f32 %v140_v19, 0.0 }
  0xe8   :  { %v227_v26 = vmax.f32 %v217_v22, 0.0  ;;  %v226_v27 = vmax.f32 %v142_v23, 0.0  ;;  %440 = vmatmul.mubr.f32.vlgmr.msra.gmra.mrb[4].mxu1 %v223_v14 }
  0xe9   :  { %v228_v29 = vmax.f32 %v219_v25, 0.0 }
  0xea   :  { %369 = vmatprep.mubr.f32.mxu0 %v226_v27 }
  0xeb   :  { %444 = vmatprep.mubr.f32.mxu1 %v228_v29  ;;  %370 = vmatmul.mubr.f32.gmra.mrb[6].mxu0 %v225_v28 }
  0xec   :  { %445 = vmatmul.mubr.f32.gmra.mrb[6].mxu1 %v227_v26 }
 0x1ba   :  { %v494_v30 = vpop.f32.mrb[4].mxu0 }
 0x1bb   :  { %v532_v31 = vpop.f32.mrb[4].mxu1  ;;  %v495_v33 = vpop.f32.mrb[5].mxu0 }
 0x1bc   :  { %v496_v34 = vadd.f32 %v495_v33, %v494_v30  ;;  %v533_v35 = vpop.f32.mrb[5].mxu1 }
 0x1bd   :  { %v534_v36 = vadd.f32 %v533_v35, %v532_v31 }
 0x1be   :  { %v367_v37 = vadd.f32 %v496_v34, %v461_v32  ;;  %v497_v38 = vpop.f32.mrb[6].mxu0 }
 0x1bf   :  { %v535_v39 = vpop.f32.mrb[6].mxu1  ;;  %v498_v40 = vpop.f32.mrb[7].mxu0 }
 0x1c0   :  { %v442_v41 = vadd.f32 %v534_v36, %v367_v37  ;;  %v499_v42 = vadd.f32 %v498_v40, %v497_v38  ;;  %v536_v43 = vpop.f32.mrb[7].mxu1 }
 0x1c1   :  { %v537_v44 = vadd.f32 %v536_v43, %v535_v39 }
 0x1c2   :  { %451 = vst.msk [vmem:[%s921_s5] sm:$0xff] %vm450_vm1, %v442_v41  ;;  %v372_v45 = vadd.f32 %v499_v42, %v461_v32 }
 0x1c4   :  { %v447_v46 = vadd.f32 %v537_v44, %v372_v45 }
 0x1c6   :  { %452 = vst.msk [vmem:[%s921_s5 + $0x8] sm:$0xff] %vm450_vm1, %v447_v46 }

</bundles_post_ra>
